<compile_context>
chip_gen: v6e
topology: v6e:2x2x1
jax: 0.10.0
libtpu: 0.0.40
codegen_flags: <defaults>
</compile_context>

<pallas_src>
import jax
import jax.numpy as jnp
from jax.experimental import pallas as pl
from jax.experimental.pallas import tpu as pltpu

LANE = 128


def _round_up(a, m):
    return -(-a // m) * m


def _linear_kernel(xt_ref, w_ref, b_ref, o_ref):
    # xt_ref: (F_in, TB) VMEM -- batch on the lane axis (lane-dense)
    # w_ref:  (F_in, 1)  VMEM -- f32 weight column, broadcast across lanes
    # b_ref:  (1,)       SMEM -- scalar f32 bias
    # o_ref:  (1, TB)    VMEM -- lane-dense output row
    x = xt_ref[...].astype(jnp.float32)          # explicit f32 path (v5e-safe)
    w = w_ref[...]                               # already f32
    # VPU broadcast multiply + XLU sublane reduce; no MXU pass for F_out == 1.
    s = jnp.sum(x * w, axis=0, keepdims=True)    # (1, TB), f32 accumulate
    o_ref[...] = (s + b_ref[0]).astype(o_ref.dtype)


def linear_forward_lane_dense(xt, weight, bias, *, tb=65536):
    """y = xt.T @ weight.T + bias, with xt already lane-dense as (F_in, B).

    This is the fast path: no wrapper-side pad/transpose at all. Producers of
    the activations should emit this (F_in, B) layout directly.
    Returns (B, F_out=1).
    """
    F_in, B = xt.shape
    F_out = weight.shape[0]
    assert F_out == 1, "kernel is specialized for nn.Linear(*, 1)"
    assert weight.shape[1] == F_in

    # Tile choice: as large as possible (amortize ~0.35 us/grid-step overhead)
    # while keeping >= 4 grid steps for large B so v7x's two TensorCores both
    # get work under dimension_semantics=("parallel",).
    b_lanes = _round_up(max(B, LANE), LANE)
    tb_eff = max(LANE, min(_round_up(tb, LANE),
                           _round_up(-(-b_lanes // 4), LANE)))
    num_steps = pl.cdiv(B, tb_eff)               # partial tail block allowed

    w_col = jnp.asarray(weight, jnp.float32).T           # (F_in, 1), stays f32
    b_s = jnp.asarray(bias, jnp.float32).reshape((1,))   # scalar bias for SMEM

    itemsize = jnp.dtype(xt.dtype).itemsize
    cost = pl.CostEstimate(
        flops=2 * B * F_in,
        transcendentals=0,
        bytes_accessed=B * F_in * itemsize + B * itemsize + F_in * 4 + 4,
    )

    # 3-deep buffering on the streamed input when the grid is long enough;
    # the compute body is tiny relative to the DMA, so this hides DMA issue
    # latency at negligible VMEM cost.
    x_pipeline = pl.Buffered(3) if num_steps >= 3 else None
    x_spec = pl.BlockSpec((F_in, tb_eff), lambda i: (0, i),
                          pipeline_mode=x_pipeline)

    out = pl.pallas_call(
        _linear_kernel,
        out_shape=jax.ShapeDtypeStruct((1, B), xt.dtype),
        grid=(num_steps,),
        in_specs=[
            x_spec,                                              # x tile stream
            pl.BlockSpec((F_in, 1), lambda i: (0, 0)),           # weight, fetched once
            pl.BlockSpec(memory_space=pltpu.MemorySpace.SMEM),   # scalar bias
        ],
        out_specs=pl.BlockSpec((1, tb_eff), lambda i: (0, i)),
        compiler_params=pltpu.CompilerParams(
            dimension_semantics=("parallel",)),   # shard batch across TCs (v7x)
        cost_estimate=cost,
    )(xt, w_col, b_s)

    return out[0].reshape(B, F_out)


def linear_forward(x, weight, bias, *, tb=65536):
    """y = x @ weight.T + bias  (PyTorch nn.Linear(10, 1) forward).

    x: (B, F_in) f32/bf16, weight: (F_out=1, F_in), bias: (F_out=1,) -> (B, 1).
    If x arrives row-major (B, F_in), exactly one HBM transpose pass is needed
    to reach the lane-dense kernel layout; prefer calling
    linear_forward_lane_dense with a producer-emitted (F_in, B) array.
    """
    return linear_forward_lane_dense(x.T, weight, bias, tb=tb)


if __name__ == "__main__":
    key = jax.random.PRNGKey(0)
    kx, kw, kb = jax.random.split(key, 3)

    B, F_in, F_out = 8, 10, 1
    x = jax.random.normal(kx, (B, F_in), dtype=jnp.float32)

    # Deterministic parameter init (mimics nn.Linear uniform(-1/sqrt(10), 1/sqrt(10)))
    bound = 1.0 / jnp.sqrt(jnp.float32(F_in))
    weight = jax.random.uniform(kw, (F_out, F_in), dtype=jnp.float32,
                                minval=-bound, maxval=bound)
    bias = jax.random.uniform(kb, (F_out,), dtype=jnp.float32,
                              minval=-bound, maxval=bound)

    # PyTorch-shaped entry point.
    y = linear_forward(x, weight, bias)
    jax.block_until_ready(y)

    # Lane-dense fast path (what a fused producer would feed directly).
    y2 = linear_forward_lane_dense(x.T, weight, bias)
    jax.block_until_ready(y2)

    # Sanity check against plain JAX reference.
    y_ref = x @ weight.T + bias
    assert y.shape == (B, F_out)
    assert jnp.allclose(y, y_ref, atol=1e-5, rtol=1e-5)
    assert jnp.allclose(y2, y_ref, atol=1e-5, rtol=1e-5)

    print("KERNEL_OK")
</pallas_src>

<mosaic_0001>
module attributes {stable_mosaic.version = 11 : i64} {
  func.func @_linear_kernel(%arg0: i32, %arg1: memref<10x128xf32, #tpu.memory_space<vmem>>, %arg2: memref<10x1xf32, #tpu.memory_space<vmem>>, %arg3: memref<1xf32, #tpu.memory_space<smem>>, %arg4: memref<1x128xf32, #tpu.memory_space<vmem>>) attributes {dimension_semantics = [#tpu.dimension_semantics<parallel>], iteration_bounds = array<i64: 1>, scalar_prefetch = 0 : i64, scratch_operands = 0 : i64, tpu.core_type = #tpu.core_type<tc>, window_params = [{transform_indices = @transform_0, window_bounds = array<i64: 10, 128>}, {pipeline_mode = #tpu.pipeline_mode<synchronous>, transform_indices = @transform_1, window_bounds = array<i64: 10, 1>}, {transform_indices = @transform_2, window_bounds = array<i64: 1>}, {transform_indices = @transform_3, window_bounds = array<i64: 1, 128>}]} {
    %c0 = arith.constant 0 : index
    %c0_0 = arith.constant 0 : index
    %0 = vector.load %arg1[%c0, %c0_0] : memref<10x128xf32, #tpu.memory_space<vmem>>, vector<10x128xf32>
    %c0_1 = arith.constant 0 : index
    %c0_2 = arith.constant 0 : index
    %1 = vector.load %arg2[%c0_1, %c0_2] : memref<10x1xf32, #tpu.memory_space<vmem>>, vector<10x1xf32>
    %2 = vector.broadcast %1 : vector<10x1xf32> to vector<10x128xf32>
    %3 = arith.mulf %0, %2 : vector<10x128xf32>
    %cst = arith.constant dense<0.000000e+00> : vector<128xf32>
    %4 = vector.multi_reduction <add>, %3, %cst [0] : vector<10x128xf32> to vector<128xf32>
    %5 = vector.shape_cast %4 : vector<128xf32> to vector<1x128xf32>
    %c0_3 = arith.constant 0 : index
    %6 = memref.load %arg3[%c0_3] : memref<1xf32, #tpu.memory_space<smem>>
    %7 = vector.broadcast %6 : f32 to vector<1x128xf32>
    %8 = arith.addf %5, %7 : vector<1x128xf32>
    %c0_4 = arith.constant 0 : index
    %c0_5 = arith.constant 0 : index
    %9 = vector.load %arg4[%c0_4, %c0_5] : memref<1x128xf32, #tpu.memory_space<vmem>>, vector<1x128xf32>
    tpu.vector_store %arg4[%c0_4, %c0_5], %8 {strides = array<i32>} : memref<1x128xf32, #tpu.memory_space<vmem>>, vector<1x128xf32>,
    return
  }
  func.func @transform_0(%arg0: i32) -> (i32, i32) {
    %c0_i32 = arith.constant 0 : i32
    %c0_i32_0 = arith.constant 0 : i32
    return %c0_i32, %arg0 : i32, i32
  }
  func.func @transform_1(%arg0: i32) -> (i32, i32) {
    %c0_i32 = arith.constant 0 : i32
    %c0_i32_0 = arith.constant 0 : i32
    %c0_i32_1 = arith.constant 0 : i32
    return %c0_i32, %c0_i32_0 : i32, i32
  }
  func.func @transform_2(%arg0: i32) -> i32 {
    %c0_i32 = arith.constant 0 : i32
    %c0_i32_0 = arith.constant 0 : i32
    return %c0_i32 : i32
  }
  func.func @transform_3(%arg0: i32) -> (i32, i32) {
    %c0_i32 = arith.constant 0 : i32
    %c0_i32_0 = arith.constant 0 : i32
    return %c0_i32, %arg0 : i32, i32
  }
}

</mosaic_0001>

<bundles_post_ra>
// kernel: tpu_custom_call.1
= control target key start
LH: loop header
LB: loop body
LE: loop exit
PB: predicated region body
PF: predicated region fallthrough
CT: control target
= control target key end

     0   :  { %v84_v1 = vmov 0   ;;  %s124_s0 = inlined_call_operand.vmem [shape: f32[10,8], index: 0, kind: input, shape index: {}]   ;;  %s125_s1 = inlined_call_operand.vmem [shape: f32[10,1], index: 1, kind: input, shape index: {}]   ;;  %s126_s2 = inlined_call_operand.<no memory space> [shape: f32[1], index: 2, kind: input, shape index: {}]   ;;  %s127_s3 = inlined_call_operand.hbm [shape: f32[1,8], index: 3, kind: output, shape index: {}]  }
   0x1   :  { %v19_v0 = vld [vmem:[%s125_s1 + $0x8] sm:$0x3]  ;;  %61 = vset.pattern.permute.xlu0 %v84_v1 }
   0x2   :  { %9 = vsyncpa [#allocation4], 0  ;;  %27 = vperm.xlu0 %61, %v19_v0   ;;  %v18_v2 = vld [vmem:[%s125_s1] sm:$0xff]  ;;  %v17_v3 = vld [vmem:[%s124_s0 + $0x8] sm:$0x3]  ;;  %vm32_vm0 = vcmask 1041408   ;;  %v42_v16 = vstv %s126_s2 }
   0x3   :  { %v16_v6 = vld [vmem:[%s124_s0] sm:$0xff]  ;;  %s85_s21 = smov [#allocation3]  }
   0x4   :  { %s51_s22 = sshll.u32 %s85_s21, 4  ;;  %s52_s22 = int_to_ptr.vmem [resolvable:$true] %s51_s22 }
   0x5   :  { %s62_s0 = scalar_lea.vmem %s52_s22, 16  ;;  %s66_s23 = scalar_lea.vmem %s52_s22, 32 }
   0x6   :  { %22 = vperm.xlu0 %61, %v18_v2   ;;  %p63_p0 = scmp.ne.s32.totalorder %s52_s22, %s62_s0  ;;  %p67_p1 = scmp.lt.s32.totalorder %s52_s22, %s52_s22 }
   0x7   :  { %p68_p2 = scmp.lt.s32.totalorder %s66_s23, %s62_s0 }
   0x9   :  { %p69_p3 = por %p68_p2, %p67_p1 }
   0xb   :  { %p70_p4 = pnand %p69_p3, %p63_p0 }
  0x7d   :  { %v28_v4 = vpop.permute.xlu0 %27 }
  0x7e   :  { %v31_v5 = vmul.f32 %v28_v4, %v17_v3 }
  0x80   :  { %v33_v9 = vsel %vm32_vm0, %v31_v5, 0.0 }
  0x81   :  { %v23_v7 = vpop.permute.xlu0 %22 }
  0x82   :  { %v30_v8 = vmul.f32 %v23_v7, %v16_v6 }
  0x84   :  { %v34_v10 = vadd.f32 %v33_v9, %v30_v8 }
  0x86   :  { %v35_v11 = vrot.slane %v34_v10, 4 }
  0x88   :  { %v36_v12 = vadd.f32 %v35_v11, %v34_v10 }
  0x8a   :  { %v37_v13 = vrot.slane %v36_v12, 2 }
  0x8c   :  { %v38_v14 = vadd.f32 %v37_v13, %v36_v12 }
  0x8e   :  { %v39_v15 = vrot.slane %v38_v14, 1 }
  0x90   :  { %v40_v17 = vadd.f32 %v39_v15, %v38_v14 }
  0x92   :  { %v43_v18 = vadd.f32 %v42_v16, %v40_v17 }
  0x94   :  { %44 = vst [vmem:[#allocation3] sm:$0x1] %v43_v18 }
  0x95   :  { %73 = shalt.err (!%p70_p4)
}
  0x96   :  { %54 = dma.vmem_to_hbm [thread:$0]  %s52_s22, 16, %s127_s3, [#allocation4]  }
  0x97   :  { %82 = dma.done.wait [#allocation4], 16  }
  0x98   :  { %83 = vsyncadd [#allocation4], 4294967280 }
  0x99   :  { %58 = vsyncpa [#allocation4], 1 }

</bundles_post_ra>
